<compile_context>
chip_gen: v7x
topology: tpu7x:2x2x1
jax: 0.10.0
libtpu: 0.0.40
codegen_flags: <defaults>
</compile_context>

<pallas_src>
import functools
import math

import jax
import jax.numpy as jnp
from jax import lax
from jax.experimental import pallas as pl
from jax.experimental.pallas import tpu as pltpu


def _round_up(x: int, m: int) -> int:
    return (x + m - 1) // m * m


_DMA_WINDOW = 16          # outstanding row-gather DMAs (power of two)
_VMEM_CAP = 64 << 20      # never ask for more scoped VMEM than v7x physical


# ---------------------------------------------------------------------------
# Path A: tiny vocab -- table resident in VMEM, one-hot MXU gather.
# ---------------------------------------------------------------------------
def _onehot_kernel(ids_ref, tab_ref, out_ref, *, scale):
    # ids_ref: (T, 1) int32 token ids (VMEM, sublane-oriented).
    # tab_ref: (vocab, d_model) table; constant index_map -> fetched once.
    # out_ref: (T, d_model) output block.
    T = out_ref.shape[0]
    vocab = tab_ref.shape[0]
    ids = ids_ref[...]                                             # (T, 1)
    iota = lax.broadcasted_iota(jnp.int32, (T, vocab), 1)          # (T, vocab)
    onehot = (ids == iota).astype(tab_ref.dtype)                   # (T, vocab)
    gathered = jnp.dot(onehot, tab_ref[...],
                       precision=lax.Precision.HIGHEST,            # exact gather
                       preferred_element_type=jnp.float32)         # (T, d_model)
    out_ref[...] = (gathered * scale).astype(out_ref.dtype)


def _embed_onehot(flat_ids, table, scale, T, n_pad):
    vocab, d_model = table.shape
    itemsize = jnp.dtype(table.dtype).itemsize
    needed = (2 * vocab * d_model * itemsize        # table (assume 2 buffers)
              + 2 * T * d_model * 4                 # out block (double buffered)
              + 2 * T * vocab * 4                   # one-hot + iota temps
              + (4 << 20))                          # slack
    vmem_limit = int(min(max(needed, 32 << 20), _VMEM_CAP))
    kernel = functools.partial(_onehot_kernel, scale=scale)
    return pl.pallas_call(
        kernel,
        out_shape=jax.ShapeDtypeStruct((n_pad, d_model), table.dtype),
        grid_spec=pltpu.PrefetchScalarGridSpec(
            num_scalar_prefetch=0,
            grid=(n_pad // T,),
            in_specs=[
                pl.BlockSpec((T, 1), lambda i: (i, 0)),             # token ids
                pl.BlockSpec((vocab, d_model), lambda i: (0, 0)),   # resident table
            ],
            out_specs=pl.BlockSpec((T, d_model), lambda i: (i, 0)),
        ),
        compiler_params=pltpu.CompilerParams(
            dimension_semantics=("parallel",),
            vmem_limit_bytes=vmem_limit,
        ),
    )(flat_ids.reshape(n_pad, 1), table)


# ---------------------------------------------------------------------------
# Path M: medium vocab -- table resident in VMEM, per-token dynamic-slice
# row gather (no HBM re-read of the table, no MXU work).
# ---------------------------------------------------------------------------
def _rowgather_kernel(ids_ref, tab_ref, out_ref, *, scale):
    # ids_ref: (T,) int32 token ids in SMEM (blocked per grid step).
    # tab_ref: (vocab, d_model) VMEM-resident table.
    # out_ref: (T, d_model) output block.
    T = out_ref.shape[0]

    @pl.loop(0, T)
    def _(s):
        row = ids_ref[s]
        vec = tab_ref[pl.ds(row, 1), :]                            # (1, d_model)
        out_ref[pl.ds(s, 1), :] = (vec.astype(jnp.float32) * scale
                                   ).astype(out_ref.dtype)


def _embed_rowgather(flat_ids, table, scale, T, n_pad):
    vocab, d_model = table.shape
    itemsize = jnp.dtype(table.dtype).itemsize
    needed = (2 * vocab * d_model * itemsize
              + 2 * T * d_model * itemsize
              + (4 << 20))
    vmem_limit = int(min(max(needed, 32 << 20), _VMEM_CAP))
    kernel = functools.partial(_rowgather_kernel, scale=scale)
    return pl.pallas_call(
        kernel,
        out_shape=jax.ShapeDtypeStruct((n_pad, d_model), table.dtype),
        grid_spec=pltpu.PrefetchScalarGridSpec(
            num_scalar_prefetch=0,
            grid=(n_pad // T,),
            in_specs=[
                pl.BlockSpec((T,), lambda i: (i,),
                             memory_space=pltpu.MemorySpace.SMEM),  # ids block
                pl.BlockSpec((vocab, d_model), lambda i: (0, 0)),   # resident table
            ],
            out_specs=pl.BlockSpec((T, d_model), lambda i: (i, 0)),
        ),
        compiler_params=pltpu.CompilerParams(
            dimension_semantics=("parallel",),
            vmem_limit_bytes=vmem_limit,
        ),
    )(flat_ids, table)


# ---------------------------------------------------------------------------
# Path B: large vocab -- table stays in HBM, manual per-row DMA gather that
# lands directly in out_ref with a sliding window of outstanding copies.
# ---------------------------------------------------------------------------
def _dma_gather_kernel(ids_ref, tab_hbm, out_ref, sems, *, scale, window):
    # ids_ref: (T,) int32 token ids in SMEM (blocked per grid step).
    # tab_hbm: (vocab, d_model) table left in HBM (memory_space=pl.ANY).
    # out_ref: (T, d_model) output block; DMA destination (no VMEM buf copy).
    # sems   : (W,) DMA semaphores -> up to W row-gathers in flight.
    T = out_ref.shape[0]
    W = window  # python int, power of two, W <= T

    def start_row(s, row):
        pltpu.make_async_copy(tab_hbm.at[pl.ds(row, 1)],
                              out_ref.at[pl.ds(s, 1)],
                              sems.at[s & (W - 1)]).start()

    def wait_row(s):
        # Wait only needs the semaphore + transfer size; src index is dummy.
        pltpu.make_async_copy(tab_hbm.at[pl.ds(0, 1)],
                              out_ref.at[pl.ds(s, 1)],
                              sems.at[s & (W - 1)]).wait()

    # Prime the window.
    @pl.loop(0, W)
    def _(s):
        start_row(s, ids_ref[s])

    # Sliding window: read the next id *before* the wait (keeps SMEM
    # sst->sld forwarding), wait for row s, launch row s + W.
    @pl.loop(0, T)
    def _(s):
        nxt = s + W
        row_next = ids_ref[jnp.minimum(nxt, T - 1)]
        wait_row(s)

        @pl.when(nxt < T)
        def _():
            start_row(nxt, row_next)

    # All rows have landed; apply sqrt(d_model) in place.
    out_ref[...] = (out_ref[...].astype(jnp.float32) * scale
                    ).astype(out_ref.dtype)


def _embed_dma(flat_ids, table, scale, T, n_pad):
    vocab, d_model = table.shape
    itemsize = jnp.dtype(table.dtype).itemsize
    W = _DMA_WINDOW if T >= _DMA_WINDOW else 8
    needed = 4 * T * d_model * itemsize + (2 << 20)
    vmem_limit = int(min(max(needed, 32 << 20), _VMEM_CAP))
    kernel = functools.partial(_dma_gather_kernel, scale=scale, window=W)
    return pl.pallas_call(
        kernel,
        out_shape=jax.ShapeDtypeStruct((n_pad, d_model), table.dtype),
        grid_spec=pltpu.PrefetchScalarGridSpec(
            num_scalar_prefetch=0,
            grid=(n_pad // T,),
            in_specs=[
                pl.BlockSpec((T,), lambda i: (i,),
                             memory_space=pltpu.MemorySpace.SMEM),  # ids block
                pl.BlockSpec(memory_space=pl.ANY),                  # table in HBM
            ],
            out_specs=pl.BlockSpec((T, d_model), lambda i: (i, 0)),
            scratch_shapes=[
                pltpu.SemaphoreType.DMA((W,)),
            ],
        ),
        compiler_params=pltpu.CompilerParams(
            dimension_semantics=("parallel",),
            vmem_limit_bytes=vmem_limit,
        ),
    )(flat_ids, table)


# ---------------------------------------------------------------------------
# Public wrapper.
# ---------------------------------------------------------------------------
def embeddings_forward(x_ids: jax.Array,
                       table: jax.Array,
                       *,
                       block_tokens: int = 256,
                       vmem_table_bytes_limit: int = 4 * 1024 * 1024,
                       max_onehot_vocab: int = 1024,
                       force_path: str | None = None) -> jax.Array:
    """table[x_ids] * sqrt(d_model). x_ids any int shape, table (vocab, d_model)."""
    orig_shape = tuple(x_ids.shape)
    vocab, d_model = table.shape
    n = max(1, math.prod(orig_shape))

    # Block sizing: if everything fits in one block, use a single sublane-legal
    # block (multiple of 8 == full dim). Otherwise use a multiple of 128 so the
    # ids block / output block are lane- and sublane-dense on every path.
    bt = max(128, (int(block_tokens) // 128) * 128)
    if n <= bt:
        T = _round_up(n, 8)
        n_pad = T
    else:
        T = bt
        n_pad = _round_up(n, T)

    flat = x_ids.reshape(n).astype(jnp.int32)
    # Clamp out-of-range ids: PyTorch would raise; on the DMA path an OOB id
    # would otherwise issue an out-of-bounds HBM DMA (hardware fault).
    flat = jnp.clip(flat, 0, vocab - 1)
    if n_pad != n:
        flat = jnp.concatenate([flat, jnp.zeros((n_pad - n,), jnp.int32)])

    scale = float(math.sqrt(d_model))
    table_bytes = vocab * d_model * jnp.dtype(table.dtype).itemsize

    path = force_path
    if path is None:
        if table_bytes <= vmem_table_bytes_limit and vocab <= max_onehot_vocab:
            path = "onehot"       # tiny vocab: MXU one-hot gather
        elif table_bytes <= vmem_table_bytes_limit:
            path = "rowgather"    # table fits VMEM: resident row gather
        else:
            path = "dma"          # huge vocab: HBM windowed DMA gather

    if path == "onehot":
        out_flat = _embed_onehot(flat, table, scale, T, n_pad)
    elif path == "rowgather":
        out_flat = _embed_rowgather(flat, table, scale, T, n_pad)
    elif path == "dma":
        out_flat = _embed_dma(flat, table, scale, T, n_pad)
    else:
        raise ValueError(f"unknown force_path: {force_path!r}")

    return out_flat[:n].reshape(*orig_shape, d_model)


if __name__ == "__main__":
    key = jax.random.PRNGKey(0)
    k_tab, k_ids, k_tab2, k_ids2 = jax.random.split(key, 4)

    # --- Test 1: small shapes (B=2, S=8), single block; all three paths. ---
    B, S, d_model, vocab_size = 2, 8, 128, 32
    table = jax.random.normal(k_tab, (vocab_size, d_model), dtype=jnp.float32)
    x_ids = jax.random.randint(k_ids, (B, S), minval=0, maxval=vocab_size,
                               dtype=jnp.int32)
    ref = table[x_ids] * math.sqrt(d_model)

    out_a = jax.block_until_ready(embeddings_forward(x_ids, table))  # onehot
    assert out_a.shape == (B, S, d_model)
    assert jnp.allclose(out_a, ref, atol=1e-4, rtol=1e-5)

    out_m = jax.block_until_ready(
        embeddings_forward(x_ids, table, force_path="rowgather"))
    assert jnp.allclose(out_m, ref, atol=1e-4, rtol=1e-5)

    out_b = jax.block_until_ready(
        embeddings_forward(x_ids, table, force_path="dma"))
    assert jnp.allclose(out_b, ref, atol=1e-4, rtol=1e-5)

    # --- Test 2: multi-block grid (n=256 tokens, T=128), all three paths. ---
    B2, S2, d2, vocab2 = 2, 128, 128, 64
    table2 = jax.random.normal(k_tab2, (vocab2, d2), dtype=jnp.float32)
    x2 = jax.random.randint(k_ids2, (B2, S2), minval=0, maxval=vocab2,
                            dtype=jnp.int32)
    ref2 = table2[x2] * math.sqrt(d2)
    for p in ("onehot", "rowgather", "dma"):
        o = jax.block_until_ready(
            embeddings_forward(x2, table2, block_tokens=128, force_path=p))
        assert o.shape == (B2, S2, d2)
        assert jnp.allclose(o, ref2, atol=1e-4, rtol=1e-5), p

    print("KERNEL_OK")
</pallas_src>

<mosaic_0001>
module attributes {stable_mosaic.version = 11 : i64} {
  func.func @_onehot_kernel(%arg0: i32, %arg1: memref<16x1xi32, #tpu.memory_space<vmem>>, %arg2: memref<32x128xf32, #tpu.memory_space<vmem>>, %arg3: memref<16x128xf32, #tpu.memory_space<vmem>>) attributes {dimension_semantics = [#tpu.dimension_semantics<parallel>], iteration_bounds = array<i64: 1>, scalar_prefetch = 0 : i64, scratch_operands = 0 : i64, tpu.core_type = #tpu.core_type<tc>, window_params = [{transform_indices = @transform_0, window_bounds = array<i64: 16, 1>}, {pipeline_mode = #tpu.pipeline_mode<synchronous>, transform_indices = @transform_1, window_bounds = array<i64: 32, 128>}, {transform_indices = @transform_2, window_bounds = array<i64: 16, 128>}]} {
    %c0 = arith.constant 0 : index
    %c0_0 = arith.constant 0 : index
    %0 = vector.load %arg1[%c0, %c0_0] : memref<16x1xi32, #tpu.memory_space<vmem>>, vector<16x1xi32>
    %1 = tpu.iota {dimensions = array<i32: 1>} : vector<16x32xi32>
    %2 = vector.broadcast %0 : vector<16x1xi32> to vector<16x32xi32>
    %3 = arith.cmpi eq, %2, %1 : vector<16x32xi32>
    %4 = arith.extui %3 : vector<16x32xi1> to vector<16x32xi32>
    %5 = arith.sitofp %4 : vector<16x32xi32> to vector<16x32xf32>
    %c0_1 = arith.constant 0 : index
    %c0_2 = arith.constant 0 : index
    %6 = vector.load %arg2[%c0_1, %c0_2] : memref<32x128xf32, #tpu.memory_space<vmem>>, vector<32x128xf32>
    %cst = arith.constant dense<0.000000e+00> : vector<16x128xf32>
    %7 = tpu.matmul %5, %6, %cst {dimension_numbers = #tpu.dot_dimension_numbers<[1], [0], [0], [1], [0, 0, 1, 1], [], []>, precision = #tpu.contract_precision<fp32>} : vector<16x32xf32>, vector<32x128xf32>, vector<16x128xf32> -> vector<16x128xf32>
    %cst_3 = arith.constant 11.3137083 : f32
    %8 = vector.broadcast %cst_3 : f32 to vector<16x128xf32>
    %9 = arith.mulf %7, %8 : vector<16x128xf32>
    %c0_4 = arith.constant 0 : index
    %c0_5 = arith.constant 0 : index
    %10 = vector.load %arg3[%c0_4, %c0_5] : memref<16x128xf32, #tpu.memory_space<vmem>>, vector<16x128xf32>
    tpu.vector_store %arg3[%c0_4, %c0_5], %9 {strides = array<i32>} : memref<16x128xf32, #tpu.memory_space<vmem>>, vector<16x128xf32>,
    return
  }
  func.func @transform_0(%arg0: i32) -> (i32, i32) {
    %c0_i32 = arith.constant 0 : i32
    %c0_i32_0 = arith.constant 0 : i32
    return %arg0, %c0_i32 : i32, i32
  }
  func.func @transform_1(%arg0: i32) -> (i32, i32) {
    %c0_i32 = arith.constant 0 : i32
    %c0_i32_0 = arith.constant 0 : i32
    %c0_i32_1 = arith.constant 0 : i32
    return %c0_i32, %c0_i32_0 : i32, i32
  }
  func.func @transform_2(%arg0: i32) -> (i32, i32) {
    %c0_i32 = arith.constant 0 : i32
    %c0_i32_0 = arith.constant 0 : i32
    return %arg0, %c0_i32 : i32, i32
  }
}

</mosaic_0001>

<bundles_post_ra>
// kernel: tpu_custom_call.1
= control target key start
LH: loop header
LB: loop body
LE: loop exit
PB: predicated region body
PF: predicated region fallthrough
CT: control target
= control target key end

     0   :  { %7 = vsyncpa [#allocation3], 0  ;;  %s906_s0 = inlined_call_operand.vmem [shape: s32[16,1], index: 0, kind: input, shape index: {}]   ;;  %s907_s1 = inlined_call_operand.hbm [shape: f32[32,128], index: 1, kind: input, shape index: {}]   ;;  %s908_s2 = inlined_call_operand.hbm [shape: f32[16,128], index: 2, kind: output, shape index: {}]  }
   0x1   :  { %8 = vsyncpa [#allocation4], 0  ;;  %s825_s9 = smov [#allocation2]   ;;  %s777_s13 = scalar_lea.hbm %s907_s1, 512 }
   0x2   :  { %s16_s10 = sshll.u32 %s825_s9, 4  ;;  %p778_p0 = scmp.ne.s32.totalorder %s907_s1, %s777_s13  ;;  %s17_s10 = int_to_ptr.vmem [resolvable:$true] %s16_s10 }
   0x3   :  { %p781_p1 = scmp.lt.u32.totalorder %s777_s13, %s907_s1 }
   0x5   :  { %p783_p2 = pnand %p781_p1, %p778_p0 }
   0x7   :  { %786 = shalt.err (!%p783_p2)
}
   0x8   :  { %s787_s18 = scalar_lea.vmem %s17_s10, 512  ;;  %p792_p4 = scmp.lt.s32.totalorder %s17_s10, %s17_s10 }
   0x9   :  { %p788_p3 = scmp.ne.s32.totalorder %s17_s10, %s787_s18  ;;  %p793_p5 = scmp.lt.s32.totalorder %s787_s18, %s787_s18 }
   0xb   :  { %p794_p6 = por %p793_p5, %p792_p4 }
   0xd   :  { %p795_p7 = pnand %p794_p6, %p788_p3 }
   0xf   :  { %798 = shalt.err (!%p795_p7)
}
  0x10   :  { %s826_s19 = smov 128   ;;  %s827_s20 = smov 8  }
  0x11   :  { %22 = dma.hbm_to_vmem [thread:$0]  %s907_s1, 512, %s17_s10, [#allocation3], %s826_s19, %s826_s19, %s827_s20  }
  0x12   :  { %821 = dma.done.wait [#allocation3], 512  }
  0x13   :  { %822 = vsyncadd [#allocation3], 4294966784  ;;  %v828_v0 = vmov 0   ;;  %v26_v1 = vld [vmem:[%s906_s0] sm:$0xff]  ;;  %v43_v3 = vld [vmem:[#allocation2 + $0x8] sm:$0xff]  ;;  %v28_v35 = vlaneseq  ;;  %vm46_vm0 = vcmask 261120  }
  0x14   :  { %776 = vset.pattern.permute.xlu0 %v828_v0  ;;  %v42_v2 = vld [vmem:[#allocation2] sm:$0xff]  ;;  %v27_v5 = vld [vmem:[%s906_s0 + $0x8] sm:$0xff]  ;;  %v57_v6 = vand.u32 4294901760, %v43_v3  ;;  %v44_v7 = vld [vmem:[#allocation2 + $0x10] sm:$0xff]  ;;  %v829_v38 = vmov 0.0   ;;  %s830_s0 = smov [#allocation5]  }
  0x15   :  { %31 = vperm.xlu0 %776, %v26_v1   ;;  %v54_v4 = vand.u32 4294901760, %v42_v2  ;;  %v45_v8 = vld [vmem:[#allocation2 + $0x18] sm:$0xff]  ;;  %v60_v10 = vand.u32 4294901760, %v44_v7  ;;  %v29_v36 = vand.u32 127, %v28_v35  ;;  %s590_s1 = sshll.u32 %s830_s0, 4  ;;  %s591_s1 = int_to_ptr.vmem [resolvable:$true] %s590_s1 }
  0x16   :  { %v63_v11 = vand.u32 4294901760, %v45_v8  ;;  %v151_v14 = vsub.f32 %v43_v3, %v57_v6  ;;  %s799_s27 = scalar_lea.vmem %s591_s1, 256  ;;  %p804_p9 = scmp.lt.s32.totalorder %s591_s1, %s591_s1 }
  0x17   :  { %v867_v9 = vpack.c.bf16 %v57_v6, %v54_v4  ;;  %v144_v13 = vsub.f32 %v42_v2, %v54_v4  ;;  %v158_v20 = vsub.f32 %v44_v7, %v60_v10  ;;  %p800_p8 = scmp.ne.s32.totalorder %s591_s1, %s799_s27  ;;  %p805_p10 = scmp.lt.s32.totalorder %s799_s27, %s799_s27 }
  0x18   :  { %v871_v12 = vpack.c.bf16 %v63_v11, %v60_v10  ;;  %v152_v16 = vand.u32 4294901760, %v151_v14  ;;  %v165_v21 = vsub.f32 %v45_v8, %v63_v11 }
  0x19   :  { %34 = vperm.xlu0 %776, %v27_v5   ;;  %737 = vmatprep.subr.bf16.mxu0 %v867_v9  ;;  %v145_v15 = vand.u32 4294901760, %v144_v13  ;;  %v159_v24 = vand.u32 4294901760, %v158_v20  ;;  %v728_v33 = vpack.c.bf16 %v151_v14, %v144_v13  ;;  %p806_p11 = por %p805_p10, %p804_p9 }
  0x1a   :  { %713 = vmatprep.subr.bf16.mxu1 %v867_v9  ;;  %739 = vmatpush3.bf16.msra.mxu0 %v867_v9  ;;  %v153_v19 = vsub.f32 %v151_v14, %v152_v16  ;;  %v166_v25 = vand.u32 4294901760, %v165_v21  ;;  %v732_v34 = vpack.c.bf16 %v165_v21, %v158_v20 }
  0x1b   :  { %715 = vmatpush3.bf16.msra.mxu1 %v867_v9  ;;  %741 = vmatprep.subr.bf16.mxu0 %v871_v12  ;;  %v744_v17 = vpack.c.bf16 %v152_v16, %v145_v15  ;;  %v146_v18 = vsub.f32 %v144_v13, %v145_v15  ;;  %v160_v28 = vsub.f32 %v158_v20, %v159_v24  ;;  %p807_p12 = pnand %p806_p11, %p800_p8 }
  0x1c   :  { %717 = vmatprep.subr.bf16.mxu1 %v871_v12  ;;  %v154_v23 = vand.u32 4294901760, %v153_v19  ;;  %v748_v27 = vpack.c.bf16 %v166_v25, %v159_v24  ;;  %v167_v29 = vsub.f32 %v165_v21, %v166_v25 }
  0x1d   :  { %v147_v22 = vand.u32 4294901760, %v146_v18  ;;  %v161_v30 = vand.u32 4294901760, %v160_v28 }
  0x1e   :  { %743 = vmatpush3.bf16.msra.mxu0 %v871_v12  ;;  %v168_v31 = vand.u32 4294901760, %v167_v29 }
  0x1f   :  { %719 = vmatpush3.bf16.msra.mxu1 %v871_v12  ;;  %745 = vmatprep.subr.bf16.mxu0 %v744_v17  ;;  %v720_v26 = vpack.c.bf16 %v154_v23, %v147_v22 }
  0x20   :  { %v724_v32 = vpack.c.bf16 %v168_v31, %v161_v30 }
  0x21   :  { %721 = vmatprep.subr.bf16.mxu1 %v720_v26 }
  0x94   :  { %v32_v37 = vpop.permute.xlu0 %31 }
  0x95   :  { %vm36_vm1 = vcmp.eq.s32.totalorder %v32_v37, %v29_v36 }
  0x96   :  { %v602_v39 = vsel %vm36_vm1, 1.0, %v829_v38 }
  0x97   :  { %v48_v40 = vsel %vm46_vm0, %v602_v39, 0 }
  0x98   :  { %v123_v41 = vsub.f32 %v48_v40, %v48_v40  ;;  %v35_v42 = vpop.permute.xlu0 %34 }
  0x99   :  { %vm37_vm2 = vcmp.eq.s32.totalorder %v35_v42, %v29_v36 }
  0x9a   :  { %v603_v43 = vsel %vm37_vm2, 1.0, %v829_v38  ;;  %v124_v44 = vand.u32 4294901760, %v123_v41 }
  0x9b   :  { %v51_v45 = vsel %vm46_vm0, %v603_v43, 0 }
  0x9c   :  { %v133_v46 = vsub.f32 %v51_v45, %v51_v45  ;;  %687 = vmatprep.mubr.f32.mxu0 %v124_v44  ;;  %v125_v47 = vsub.f32 %v123_v41, %v124_v44 }
  0x9e   :  { %v126_v48 = vand.u32 4294901760, %v125_v47  ;;  %v134_v49 = vand.u32 4294901760, %v133_v46 }
  0xa0   :  { %654 = vmatprep.mubr.f32.mxu1 %v126_v48  ;;  %688 = vmatmul.mubr.f32.vlgmr.msra.gmra.mrb[0].mxu0 %v134_v49  ;;  %v135_v50 = vsub.f32 %v133_v46, %v134_v49 }
  0xa1   :  { %747 = vmatpush3.bf16.msra.mxu0 %v744_v17  ;;  %698 = vmatprep.mubr.msk.f32.mxu0 %vm46_vm0, %v602_v39 }
  0xa2   :  { %v136_v51 = vand.u32 4294901760, %v135_v50  ;;  %749 = vmatprep.subr.bf16.mxu0 %v748_v27 }
  0xa4   :  { %655 = vmatmul.mubr.f32.vlgmr.msra.gmra.mrb[0].mxu1 %v136_v51 }
  0xa5   :  { %723 = vmatpush3.bf16.msra.mxu1 %v720_v26  ;;  %665 = vmatprep.mubr.msk.f32.mxu1 %vm46_vm0, %v602_v39 }
  0xa6   :  { %751 = vmatpush3.bf16.msra.mxu0 %v748_v27  ;;  %725 = vmatprep.subr.bf16.mxu1 %v724_v32 }
  0xa7   :  { %753 = vmatprep.subr.bf16.mxu0 %v867_v9 }
  0xa9   :  { %727 = vmatpush3.bf16.msra.mxu1 %v724_v32  ;;  %699 = vmatmul.mubr.msk.f32.vlgmr.msra.gmra.mrb[0].mxu0 %vm46_vm0, %v603_v43 }
  0xaa   :  { %755 = vmatpush3.bf16.msra.mxu0 %v867_v9  ;;  %709 = vmatprep.mubr.msk.f32.mxu0 %vm46_vm0, %v602_v39 }
  0xab   :  { %729 = vmatprep.subr.bf16.mxu1 %v728_v33  ;;  %757 = vmatprep.subr.bf16.mxu0 %v871_v12 }
  0xac   :  { %666 = vmatmul.mubr.msk.f32.vlgmr.msra.gmra.mrb[0].mxu1 %vm46_vm0, %v603_v43 }
  0xad   :  { %731 = vmatpush3.bf16.msra.mxu1 %v728_v33  ;;  %676 = vmatprep.mubr.f32.mxu1 %v123_v41 }
  0xae   :  { %759 = vmatpush3.bf16.msra.mxu0 %v871_v12  ;;  %733 = vmatprep.subr.bf16.mxu1 %v732_v34 }
  0xb1   :  { %735 = vmatpush3.bf16.msra.mxu1 %v732_v34  ;;  %710 = vmatmul.mubr.msk.f32.vlgmr.msra.gmra.mrb[0].mxu0 %vm46_vm0, %v603_v43 }
  0xb4   :  { %677 = vmatmul.mubr.f32.vlgmr.msra.gmra.mrb[0].mxu1 %v133_v46 }
 0x184   :  { %v711_v52 = vpop.f32.mrb[0].mxu0 }
 0x185   :  { %v571_v53 = vpop.f32.mrb[1].mxu0 }
 0x187   :  { %v678_v54 = vpop.f32.mrb[0].mxu1 }
 0x188   :  { %v760_v55 = vadd.f32 %v711_v52, %v678_v54  ;;  %v315_v56 = vpop.f32.mrb[1].mxu1 }
 0x189   :  { %v761_v57 = vadd.f32 %v571_v53, %v315_v56 }
 0x18a   :  { %v582_v58 = vmul.f32 11.313708, %v760_v55 }
 0x18b   :  { %v581_v59 = vmul.f32 11.313708, %v761_v57 }
 0x18c   :  { %584 = vst [vmem:[#allocation5 + $0x8] sm:$0xff] %v582_v58 }
 0x18d   :  { %583 = vst [vmem:[#allocation5] sm:$0xff] %v581_v59 }
 0x18e   :  { %810 = shalt.err (!%p807_p12)
}
 0x18f   :  { %s811_s30 = scalar_lea.hbm %s908_s2, 256 }
 0x190   :  { %p812_p13 = scmp.ne.s32.totalorder %s908_s2, %s811_s30  ;;  %p815_p0 = scmp.lt.u32.totalorder %s811_s30, %s908_s2 }
 0x192   :  { %p817_p1 = pnand %p815_p0, %p812_p13 }
 0x194   :  { %820 = shalt.err (!%p817_p1)
}
 0x195   :  { %596 = dma.vmem_to_hbm [thread:$0]  %s591_s1, 256, %s908_s2, [#allocation4], %s826_s19, %s826_s19, %s827_s20  }
 0x196   :  { %823 = dma.done.wait [#allocation4], 256  }
 0x197   :  { %824 = vsyncadd [#allocation4], 4294967040 }
 0x198   :  { %600 = vsyncpa [#allocation3], 1 }
 0x199   :  { %601 = vsyncpa [#allocation4], 1 }

</bundles_post_ra>
